<compile_context>
chip_gen: v7x
topology: tpu7x:2x2x1
jax: 0.10.0
libtpu: 0.0.40
codegen_flags: <defaults>
</compile_context>

<pallas_src>
import functools

import jax
import jax.numpy as jnp
from jax.experimental import pallas as pl
from jax.experimental.pallas import tpu as pltpu

_PACK = 8        # batch rows packed per lane-row
_SUBLANE = 8     # f32 sublane granularity


def _round_up(x: int, m: int) -> int:
    return ((x + m - 1) // m) * m


def _block_diag(w, reps: int):
    """(k, n) -> (reps*k, reps*n) block-diagonal blockdiag(w, ..., w)."""
    k, n = w.shape
    eye = jnp.eye(reps, dtype=w.dtype)
    return (eye[:, None, :, None] * w[None, :, None, :]).reshape(reps * k, reps * n)


def _mlp_kernel(x_ref, w1_ref, b1_ref, w2_ref, b2_ref, o_ref):
    # Hidden layer: MXU matmul with f32 accumulation, bias + ReLU on the VPU.
    h = jnp.dot(x_ref[...], w1_ref[...], preferred_element_type=jnp.float32)
    h = jnp.maximum(h + b1_ref[...], 0.0)
    # Output layer.  Cast h to the weight dtype so a bf16 weight path stays on
    # the bf16 MXU datapath; for f32 weights this is a no-op.
    y = jnp.dot(h.astype(w2_ref.dtype), w2_ref[...],
                preferred_element_type=jnp.float32)
    o_ref[...] = (y + b2_ref[...]).astype(o_ref.dtype)


@functools.partial(jax.jit, static_argnames=("block_rows",))
def simpleton_forward(x, w1, b1, w2, b2, *, block_rows: int = 1024):
    """Fused MLP forward: relu(x @ w1 + b1) @ w2 + b2.

    x : (B, n_feature)            (f32 or bf16; bf16 is used directly)
    w1: (n_feature, n_hidden), b1: (1, n_hidden) or (n_hidden,)
    w2: (n_hidden, n_output),  b2: (1, n_output) or (n_output,)
    block_rows: packed (B/8) rows per grid step.
    returns (B, n_output) float32.
    """
    B, F = x.shape
    H = w1.shape[1]
    O = w2.shape[1]

    # ---- Pack 8 batch rows per lane-row via block-diagonal weights. ----
    w1p = _block_diag(w1, _PACK)                      # (8F, 8H) = (256, 256)
    w2p = _block_diag(w2, _PACK)                      # (8H, 8O) = (256, 128)
    b1p = jnp.tile(b1.reshape(1, H), (1, _PACK))      # (1, 8H)
    b2p = jnp.tile(b2.reshape(1, O), (1, _PACK))      # (1, 8O)
    Fp, Hp, Op = _PACK * F, _PACK * H, _PACK * O

    # ---- Packed-row tiling: spread rows evenly over the grid so padding
    # stays small; tile must respect the sublane granularity of x's dtype. ----
    itemsize = jnp.dtype(x.dtype).itemsize
    sublane = _SUBLANE * max(1, 4 // itemsize)        # 8 (f32) / 16 (bf16)
    R = pl.cdiv(B, _PACK)                             # packed rows needed
    num_tiles = max(1, pl.cdiv(R, block_rows))
    TR = _round_up(pl.cdiv(R, num_tiles), sublane)
    R_pad = num_tiles * TR
    rows_needed = R_pad * _PACK

    if rows_needed != B:
        # Padded rows produce relu(b1)@W2 + b2 garbage; it is sliced off below.
        x = jnp.pad(x, ((0, rows_needed - B), (0, 0)))
    xp = x.reshape(R_pad, Fp)                         # contiguous reshape

    # Only raise the scoped-VMEM limit when the tiles actually need it
    # (v5e default is 16 MiB; default block_rows stays far below that).
    vmem_est = (2 * TR * (Fp * itemsize + Op * 4)
                + Fp * Hp * jnp.dtype(w1.dtype).itemsize
                + Hp * Op * jnp.dtype(w2.dtype).itemsize
                + (Hp + Op) * 4)
    vmem_kwargs = {}
    if vmem_est > 12 * 1024 * 1024:
        vmem_kwargs = {"vmem_limit_bytes": min(2 * vmem_est, 64 * 1024 * 1024)}

    out = pl.pallas_call(
        _mlp_kernel,
        out_shape=jax.ShapeDtypeStruct((R_pad, Op), jnp.float32),
        grid_spec=pltpu.PrefetchScalarGridSpec(
            num_scalar_prefetch=0,
            grid=(num_tiles,),
            in_specs=[
                # Packed x: tiled along the packed-batch axis.
                pl.BlockSpec((TR, Fp), lambda i: (i, 0)),
                # Weights / biases: constant block index -> DMA'd once, reused.
                pl.BlockSpec((Fp, Hp), lambda i: (0, 0)),
                pl.BlockSpec((1, Hp), lambda i: (0, 0)),
                pl.BlockSpec((Hp, Op), lambda i: (0, 0)),
                pl.BlockSpec((1, Op), lambda i: (0, 0)),
            ],
            out_specs=pl.BlockSpec((TR, Op), lambda i: (i, 0)),
        ),
        compiler_params=pltpu.CompilerParams(
            dimension_semantics=("parallel",),
            **vmem_kwargs,
        ),
    )(xp, w1p, b1p, w2p, b2p)

    # Unpack (R_pad, 8*O) -> (B, O): contiguous reshape, slice off batch pad.
    return out.reshape(rows_needed, O)[:B]


if __name__ == "__main__":
    # Simpleton set_up = {"n_feature": 32, "n_hidden": 32, "n_output": 16}
    n_feature, n_hidden, n_output = 32, 32, 16

    key = jax.random.PRNGKey(0)
    kx, kw1, kb1, kw2, kb2, kxl, kxr = jax.random.split(key, 7)

    # Deterministic init mimicking torch.nn.Linear's U(-1/sqrt(fan_in), ...).
    bound1 = 1.0 / jnp.sqrt(jnp.float32(n_feature))
    w1 = jax.random.uniform(kw1, (n_feature, n_hidden), jnp.float32, -bound1, bound1)
    b1 = jax.random.uniform(kb1, (1, n_hidden), jnp.float32, -bound1, bound1)
    bound2 = 1.0 / jnp.sqrt(jnp.float32(n_hidden))
    w2 = jax.random.uniform(kw2, (n_hidden, n_output), jnp.float32, -bound2, bound2)
    b2 = jax.random.uniform(kb2, (1, n_output), jnp.float32, -bound2, bound2)

    def ref_fn(xx):
        return jnp.maximum(xx.astype(jnp.float32) @ w1 + b1, 0.0) @ w2 + b2

    # --- Small batch (the original Simpleton test shape); grid=(1,). ---
    B_small = 8
    x_small = jax.random.normal(kx, (B_small, n_feature), dtype=jnp.float32)
    out_small = jax.block_until_ready(simpleton_forward(x_small, w1, b1, w2, b2))
    assert out_small.shape == (B_small, n_output)
    assert jnp.allclose(out_small, ref_fn(x_small), atol=1e-5, rtol=1e-5)

    # --- Larger batch, multi-step grid (64 packed rows = 512 batch rows/step)
    #     to exercise the pipelined, weight-resident path. ---
    B_large = 2048
    x_large = jax.random.normal(kxl, (B_large, n_feature), dtype=jnp.float32)
    out_large = jax.block_until_ready(
        simpleton_forward(x_large, w1, b1, w2, b2, block_rows=64))
    assert out_large.shape == (B_large, n_output)
    assert jnp.allclose(out_large, ref_fn(x_large), atol=1e-5, rtol=1e-5)

    # --- Ragged batch (not a multiple of 8 / of the tile): pad + slice path. ---
    B_ragged = 1003
    x_ragged = jax.random.normal(kxr, (B_ragged, n_feature), dtype=jnp.float32)
    out_ragged = jax.block_until_ready(
        simpleton_forward(x_ragged, w1, b1, w2, b2, block_rows=32))
    assert out_ragged.shape == (B_ragged, n_output)
    assert jnp.allclose(out_ragged, ref_fn(x_ragged), atol=1e-5, rtol=1e-5)

    # --- bf16-in-HBM path: x / weights already bf16 before the call (no
    #     in-kernel casts), f32 MXU accumulation, f32 output. ---
    x_bf16 = x_large.astype(jnp.bfloat16)
    w1_bf16, w2_bf16 = w1.astype(jnp.bfloat16), w2.astype(jnp.bfloat16)
    out_bf16 = jax.block_until_ready(
        simpleton_forward(x_bf16, w1_bf16, b1, w2_bf16, b2, block_rows=64))
    assert out_bf16.shape == (B_large, n_output)
    assert jnp.allclose(out_bf16, ref_fn(x_large), atol=5e-2, rtol=5e-2)

    print("KERNEL_OK")
</pallas_src>

<mosaic_0001>
module attributes {stable_mosaic.version = 11 : i64} {
  func.func @_mlp_kernel(%arg0: i32, %arg1: memref<8x256xf32, #tpu.memory_space<vmem>>, %arg2: memref<256x256xf32, #tpu.memory_space<vmem>>, %arg3: memref<1x256xf32, #tpu.memory_space<vmem>>, %arg4: memref<256x128xf32, #tpu.memory_space<vmem>>, %arg5: memref<1x128xf32, #tpu.memory_space<vmem>>, %arg6: memref<8x128xf32, #tpu.memory_space<vmem>>) attributes {dimension_semantics = [#tpu.dimension_semantics<parallel>], iteration_bounds = array<i64: 1>, scalar_prefetch = 0 : i64, scratch_operands = 0 : i64, tpu.core_type = #tpu.core_type<tc>, window_params = [{transform_indices = @transform_0, window_bounds = array<i64: 8, 256>}, {pipeline_mode = #tpu.pipeline_mode<synchronous>, transform_indices = @transform_1, window_bounds = array<i64: 256, 256>}, {pipeline_mode = #tpu.pipeline_mode<synchronous>, transform_indices = @transform_2, window_bounds = array<i64: 1, 256>}, {pipeline_mode = #tpu.pipeline_mode<synchronous>, transform_indices = @transform_3, window_bounds = array<i64: 256, 128>}, {pipeline_mode = #tpu.pipeline_mode<synchronous>, transform_indices = @transform_4, window_bounds = array<i64: 1, 128>}, {transform_indices = @transform_5, window_bounds = array<i64: 8, 128>}]} {
    %c0 = arith.constant 0 : index
    %c0_0 = arith.constant 0 : index
    %0 = vector.load %arg1[%c0, %c0_0] : memref<8x256xf32, #tpu.memory_space<vmem>>, vector<8x256xf32>
    %c0_1 = arith.constant 0 : index
    %c0_2 = arith.constant 0 : index
    %1 = vector.load %arg2[%c0_1, %c0_2] : memref<256x256xf32, #tpu.memory_space<vmem>>, vector<256x256xf32>
    %cst = arith.constant dense<0.000000e+00> : vector<8x256xf32>
    %2 = tpu.matmul %0, %1, %cst {dimension_numbers = #tpu.dot_dimension_numbers<[1], [0], [0], [1], [0, 0, 1, 1], [], []>} : vector<8x256xf32>, vector<256x256xf32>, vector<8x256xf32> -> vector<8x256xf32>
    %c0_3 = arith.constant 0 : index
    %c0_4 = arith.constant 0 : index
    %3 = vector.load %arg3[%c0_3, %c0_4] : memref<1x256xf32, #tpu.memory_space<vmem>>, vector<1x256xf32>
    %4 = vector.broadcast %3 : vector<1x256xf32> to vector<8x256xf32>
    %5 = arith.addf %2, %4 : vector<8x256xf32>
    %cst_5 = arith.constant 0.000000e+00 : f32
    %6 = vector.broadcast %cst_5 : f32 to vector<8x256xf32>
    %7 = arith.maximumf %5, %6 : vector<8x256xf32>
    %c0_6 = arith.constant 0 : index
    %c0_7 = arith.constant 0 : index
    %8 = vector.load %arg4[%c0_6, %c0_7] : memref<256x128xf32, #tpu.memory_space<vmem>>, vector<256x128xf32>
    %cst_8 = arith.constant dense<0.000000e+00> : vector<8x128xf32>
    %9 = tpu.matmul %7, %8, %cst_8 {dimension_numbers = #tpu.dot_dimension_numbers<[1], [0], [0], [1], [0, 0, 1, 1], [], []>} : vector<8x256xf32>, vector<256x128xf32>, vector<8x128xf32> -> vector<8x128xf32>
    %c0_9 = arith.constant 0 : index
    %c0_10 = arith.constant 0 : index
    %10 = vector.load %arg5[%c0_9, %c0_10] : memref<1x128xf32, #tpu.memory_space<vmem>>, vector<1x128xf32>
    %11 = vector.broadcast %10 : vector<1x128xf32> to vector<8x128xf32>
    %12 = arith.addf %9, %11 : vector<8x128xf32>
    %c0_11 = arith.constant 0 : index
    %c0_12 = arith.constant 0 : index
    %13 = vector.load %arg6[%c0_11, %c0_12] : memref<8x128xf32, #tpu.memory_space<vmem>>, vector<8x128xf32>
    tpu.vector_store %arg6[%c0_11, %c0_12], %12 {strides = array<i32>} : memref<8x128xf32, #tpu.memory_space<vmem>>, vector<8x128xf32>,
    return
  }
  func.func @transform_0(%arg0: i32) -> (i32, i32) {
    %c0_i32 = arith.constant 0 : i32
    %c0_i32_0 = arith.constant 0 : i32
    return %arg0, %c0_i32 : i32, i32
  }
  func.func @transform_1(%arg0: i32) -> (i32, i32) {
    %c0_i32 = arith.constant 0 : i32
    %c0_i32_0 = arith.constant 0 : i32
    %c0_i32_1 = arith.constant 0 : i32
    return %c0_i32, %c0_i32_0 : i32, i32
  }
  func.func @transform_2(%arg0: i32) -> (i32, i32) {
    %c0_i32 = arith.constant 0 : i32
    %c0_i32_0 = arith.constant 0 : i32
    %c0_i32_1 = arith.constant 0 : i32
    return %c0_i32, %c0_i32_0 : i32, i32
  }
  func.func @transform_3(%arg0: i32) -> (i32, i32) {
    %c0_i32 = arith.constant 0 : i32
    %c0_i32_0 = arith.constant 0 : i32
    %c0_i32_1 = arith.constant 0 : i32
    return %c0_i32, %c0_i32_0 : i32, i32
  }
  func.func @transform_4(%arg0: i32) -> (i32, i32) {
    %c0_i32 = arith.constant 0 : i32
    %c0_i32_0 = arith.constant 0 : i32
    %c0_i32_1 = arith.constant 0 : i32
    return %c0_i32, %c0_i32_0 : i32, i32
  }
  func.func @transform_5(%arg0: i32) -> (i32, i32) {
    %c0_i32 = arith.constant 0 : i32
    %c0_i32_0 = arith.constant 0 : i32
    return %arg0, %c0_i32 : i32, i32
  }
}

</mosaic_0001>

<bundles_post_ra>
// kernel: simpleton_forward.1
= control target key start
LH: loop header
LB: loop body
LE: loop exit
PB: predicated region body
PF: predicated region fallthrough
CT: control target
= control target key end

     0   :  { %s750_s1 = inlined_call_operand.vmem [shape: f32[256,256], index: 1, kind: input, shape index: {}]   ;;  %s751_s0 = inlined_call_operand.vmem [shape: f32[8,256], index: 0, kind: input, shape index: {}]   ;;  %s752_s3 = inlined_call_operand.vmem [shape: f32[256,128], index: 3, kind: input, shape index: {}]   ;;  %s753_s2 = inlined_call_operand.vmem [shape: f32[1,256], index: 2, kind: input, shape index: {}]   ;;  %s754_s4 = inlined_call_operand.vmem [shape: f32[1,128], index: 4, kind: input, shape index: {}]   ;;  %s755_s5 = inlined_call_operand.vmem [shape: f32[8,128], index: 5, kind: output, shape index: {}]  }
   0x1   :  { %v23_v0 = vld [vmem:[%s750_s1 + $0x8] sm:$0xff]  ;;  %v25_v1 = vld [vmem:[%s750_s1 + $0x18] sm:$0xff]  ;;  %v22_v2 = vld [vmem:[%s750_s1] sm:$0xff] }
   0x2   :  { %v321_v3 = vpack.c.bf16 %v25_v1, %v23_v0  ;;  %v24_v4 = vld [vmem:[%s750_s1 + $0x10] sm:$0xff]  ;;  %v27_v5 = vld [vmem:[%s750_s1 + $0x28] sm:$0xff]  ;;  %v29_v6 = vld [vmem:[%s750_s1 + $0x38] sm:$0xff] }
   0x3   :  { %v323_v7 = vpack.c.bf16 %v24_v4, %v22_v2  ;;  %v325_v8 = vpack.c.bf16 %v29_v6, %v27_v5  ;;  %v26_v9 = vld [vmem:[%s750_s1 + $0x20] sm:$0xff]  ;;  %v28_v10 = vld [vmem:[%s750_s1 + $0x30] sm:$0xff]  ;;  %v31_v11 = vld [vmem:[%s750_s1 + $0x48] sm:$0xff] }
   0x4   :  { %322 = vmatprep.subr.bf16.mxu0 %v321_v3  ;;  %v33_v12 = vld [vmem:[%s750_s1 + $0x58] sm:$0xff]  ;;  %v327_v13 = vpack.c.bf16 %v28_v10, %v26_v9  ;;  %v30_v15 = vld [vmem:[%s750_s1 + $0x40] sm:$0xff]  ;;  %v32_v16 = vld [vmem:[%s750_s1 + $0x50] sm:$0xff] }
   0x5   :  { %324 = vmatpush1.bf16.msra.mxu0 %v323_v7  ;;  %v329_v14 = vpack.c.bf16 %v33_v12, %v31_v11  ;;  %v35_v17 = vld [vmem:[%s750_s1 + $0x68] sm:$0xff]  ;;  %v37_v18 = vld [vmem:[%s750_s1 + $0x78] sm:$0xff]  ;;  %v331_v19 = vpack.c.bf16 %v32_v16, %v30_v15  ;;  %v34_v21 = vld [vmem:[%s750_s1 + $0x60] sm:$0xff] }
   0x6   :  { %326 = vmatprep.subr.bf16.mxu0 %v325_v8  ;;  %v333_v20 = vpack.c.bf16 %v37_v18, %v35_v17  ;;  %v36_v22 = vld [vmem:[%s750_s1 + $0x70] sm:$0xff]  ;;  %v39_v23 = vld [vmem:[%s750_s1 + $0x88] sm:$0xff]  ;;  %v41_v24 = vld [vmem:[%s750_s1 + $0x98] sm:$0xff] }
   0x7   :  { %v335_v25 = vpack.c.bf16 %v36_v22, %v34_v21  ;;  %v337_v26 = vpack.c.bf16 %v41_v24, %v39_v23  ;;  %v38_v27 = vld [vmem:[%s750_s1 + $0x80] sm:$0xff]  ;;  %v40_v28 = vld [vmem:[%s750_s1 + $0x90] sm:$0xff]  ;;  %v43_v29 = vld [vmem:[%s750_s1 + $0xa8] sm:$0xff] }
   0x8   :  { %v45_v30 = vld [vmem:[%s750_s1 + $0xb8] sm:$0xff]  ;;  %v339_v31 = vpack.c.bf16 %v40_v28, %v38_v27  ;;  %v42_v33 = vld [vmem:[%s750_s1 + $0xa0] sm:$0xff]  ;;  %v44_v34 = vld [vmem:[%s750_s1 + $0xb0] sm:$0xff] }
   0x9   :  { %328 = vmatpush1.bf16.msra.mxu0 %v327_v13  ;;  %v341_v32 = vpack.c.bf16 %v45_v30, %v43_v29  ;;  %v47_v35 = vld [vmem:[%s750_s1 + $0xc8] sm:$0xff]  ;;  %v49_v36 = vld [vmem:[%s750_s1 + $0xd8] sm:$0xff]  ;;  %v343_v37 = vpack.c.bf16 %v44_v34, %v42_v33  ;;  %v46_v38 = vld [vmem:[%s750_s1 + $0xc0] sm:$0xff] }
   0xa   :  { %330 = vmatprep.subr.bf16.mxu0 %v329_v14  ;;  %v48_v39 = vld [vmem:[%s750_s1 + $0xd0] sm:$0xff]  ;;  %v345_v40 = vpack.c.bf16 %v49_v36, %v47_v35  ;;  %v51_v41 = vld [vmem:[%s750_s1 + $0xe8] sm:$0xff]  ;;  %v53_v42 = vld [vmem:[%s750_s1 + $0xf8] sm:$0xff] }
   0xb   :  { %v21_v43 = vld [vmem:[%s751_s0 + $0x8] sm:$0xff]  ;;  %v187_v44 = vld [vmem:[%s752_s3 + $0x80] sm:$0xff]  ;;  %v189_v49 = vld [vmem:[%s752_s3 + $0x90] sm:$0xff]  ;;  %v347_v51 = vpack.c.bf16 %v48_v39, %v46_v38  ;;  %v349_v57 = vpack.c.bf16 %v53_v42, %v51_v41 }
   0xc   :  { %162 = vmatprep.mubr.f32.mxu0 %v21_v43  ;;  %v188_v45 = vld [vmem:[%s752_s3 + $0x88] sm:$0xff]  ;;  %v171_v46 = vld [vmem:[%s752_s3] sm:$0xff]  ;;  %v190_v50 = vld [vmem:[%s752_s3 + $0x98] sm:$0xff] }
   0xd   :  { %332 = vmatpush1.bf16.msra.mxu0 %v331_v19  ;;  %v385_v47 = vpack.c.bf16 %v188_v45, %v187_v44  ;;  %v172_v48 = vld [vmem:[%s752_s3 + $0x8] sm:$0xff]  ;;  %v389_v53 = vpack.c.bf16 %v190_v50, %v189_v49  ;;  %v173_v54 = vld [vmem:[%s752_s3 + $0x10] sm:$0xff]  ;;  %v174_v55 = vld [vmem:[%s752_s3 + $0x18] sm:$0xff] }
   0xe   :  { %334 = vmatprep.subr.bf16.mxu0 %v333_v20  ;;  %v387_v52 = vpack.c.bf16 %v172_v48, %v171_v46  ;;  %v191_v56 = vld [vmem:[%s752_s3 + $0xa0] sm:$0xff]  ;;  %v52_v59 = vld [vmem:[%s750_s1 + $0xf0] sm:$0xff]  ;;  %v192_v60 = vld [vmem:[%s752_s3 + $0xa8] sm:$0xff]  ;;  %v391_v63 = vpack.c.bf16 %v174_v55, %v173_v54 }
   0xf   :  { %v50_v58 = vld [vmem:[%s750_s1 + $0xe0] sm:$0xff]  ;;  %386 = vmatprep.subr.bf16.mxu1 %v385_v47  ;;  %v55_v61 = vld [vmem:[%s750_s1 + $0x108] sm:$0xff]  ;;  %v57_v62 = vld [vmem:[%s750_s1 + $0x118] sm:$0xff]  ;;  %v393_v0 = vpack.c.bf16 %v192_v60, %v191_v56 }
  0x10   :  { %388 = vmatpush3.bf16.msra.mxu1 %v387_v52  ;;  %v175_v1 = vld [vmem:[%s752_s3 + $0x20] sm:$0xff]  ;;  %v176_v2 = vld [vmem:[%s752_s3 + $0x28] sm:$0xff]  ;;  %v351_v3 = vpack.c.bf16 %v52_v59, %v50_v58  ;;  %v193_v4 = vld [vmem:[%s752_s3 + $0xb0] sm:$0xff]  ;;  %v353_v6 = vpack.c.bf16 %v57_v62, %v55_v61 }
  0x11   :  { %336 = vmatpush1.bf16.msra.mxu0 %v335_v25  ;;  %390 = vmatprep.subr.bf16.mxu1 %v389_v53  ;;  %v194_v5 = vld [vmem:[%s752_s3 + $0xb8] sm:$0xff]  ;;  %v54_v7 = vld [vmem:[%s750_s1 + $0x100] sm:$0xff]  ;;  %v56_v8 = vld [vmem:[%s750_s1 + $0x110] sm:$0xff]  ;;  %v395_v11 = vpack.c.bf16 %v176_v2, %v175_v1 }
  0x12   :  { %338 = vmatprep.subr.bf16.mxu0 %v337_v26  ;;  %v59_v9 = vld [vmem:[%s750_s1 + $0x128] sm:$0xff]  ;;  %v61_v10 = vld [vmem:[%s750_s1 + $0x138] sm:$0xff]  ;;  %v397_v12 = vpack.c.bf16 %v194_v5, %v193_v4  ;;  %v177_v13 = vld [vmem:[%s752_s3 + $0x30] sm:$0xff]  ;;  %v355_v15 = vpack.c.bf16 %v56_v8, %v54_v7 }
  0x13   :  { %v178_v14 = vld [vmem:[%s752_s3 + $0x38] sm:$0xff]  ;;  %v195_v16 = vld [vmem:[%s752_s3 + $0xc0] sm:$0xff]  ;;  %v196_v17 = vld [vmem:[%s752_s3 + $0xc8] sm:$0xff]  ;;  %v357_v18 = vpack.c.bf16 %v61_v10, %v59_v9 }
  0x14   :  { %392 = vmatpush3.bf16.msra.mxu1 %v391_v63  ;;  %v58_v19 = vld [vmem:[%s750_s1 + $0x120] sm:$0xff]  ;;  %v60_v20 = vld [vmem:[%s750_s1 + $0x130] sm:$0xff]  ;;  %v63_v21 = vld [vmem:[%s750_s1 + $0x148] sm:$0xff]  ;;  %v399_v23 = vpack.c.bf16 %v178_v14, %v177_v13  ;;  %v401_v24 = vpack.c.bf16 %v196_v17, %v195_v16 }
  0x15   :  { %340 = vmatpush1.bf16.msra.mxu0 %v339_v31  ;;  %394 = vmatprep.subr.bf16.mxu1 %v393_v0  ;;  %v65_v22 = vld [vmem:[%s750_s1 + $0x158] sm:$0xff]  ;;  %v179_v25 = vld [vmem:[%s752_s3 + $0x40] sm:$0xff]  ;;  %v180_v26 = vld [vmem:[%s752_s3 + $0x48] sm:$0xff]  ;;  %v359_v27 = vpack.c.bf16 %v60_v20, %v58_v19 }
  0x16   :  { %342 = vmatprep.subr.bf16.mxu0 %v341_v32  ;;  %v197_v28 = vld [vmem:[%s752_s3 + $0xd0] sm:$0xff]  ;;  %v198_v29 = vld [vmem:[%s752_s3 + $0xd8] sm:$0xff]  ;;  %v361_v30 = vpack.c.bf16 %v65_v22, %v63_v21  ;;  %v62_v31 = vld [vmem:[%s750_s1 + $0x140] sm:$0xff]  ;;  %v403_v35 = vpack.c.bf16 %v180_v26, %v179_v25 }
  0x17   :  { %v64_v32 = vld [vmem:[%s750_s1 + $0x150] sm:$0xff]  ;;  %v67_v33 = vld [vmem:[%s750_s1 + $0x168] sm:$0xff]  ;;  %v69_v34 = vld [vmem:[%s750_s1 + $0x178] sm:$0xff]  ;;  %v405_v36 = vpack.c.bf16 %v198_v29, %v197_v28 }
  0x18   :  { %396 = vmatpush3.bf16.msra.mxu1 %v395_v11  ;;  %v182_v38 = vld [vmem:[%s752_s3 + $0x58] sm:$0xff]  ;;  %v363_v39 = vpack.c.bf16 %v64_v32, %v62_v31  ;;  %v200_v41 = vld [vmem:[%s752_s3 + $0xe8] sm:$0xff]  ;;  %v365_v42 = vpack.c.bf16 %v69_v34, %v67_v33  ;;  %v66_v43 = vld [vmem:[%s750_s1 + $0x160] sm:$0xff] }
  0x19   :  { %344 = vmatpush1.bf16.msra.mxu0 %v343_v37  ;;  %398 = vmatprep.subr.bf16.mxu1 %v397_v12  ;;  %v181_v37 = vld [vmem:[%s752_s3 + $0x50] sm:$0xff]  ;;  %v71_v45 = vld [vmem:[%s750_s1 + $0x188] sm:$0xff]  ;;  %v73_v46 = vld [vmem:[%s750_s1 + $0x198] sm:$0xff] }
  0x1a   :  { %346 = vmatprep.subr.bf16.mxu0 %v345_v40  ;;  %v199_v40 = vld [vmem:[%s752_s3 + $0xe0] sm:$0xff]  ;;  %v68_v44 = vld [vmem:[%s750_s1 + $0x170] sm:$0xff]  ;;  %v407_v47 = vpack.c.bf16 %v182_v38, %v181_v37  ;;  %v369_v50 = vpack.c.bf16 %v73_v46, %v71_v45  ;;  %v75_v53 = vld [vmem:[%s750_s1 + $0x1a8] sm:$0xff] }
  0x1b   :  { %v409_v48 = vpack.c.bf16 %v200_v41, %v199_v40  ;;  %v367_v49 = vpack.c.bf16 %v68_v44, %v66_v43  ;;  %v72_v52 = vld [vmem:[%s750_s1 + $0x190] sm:$0xff]  ;;  %v77_v54 = vld [vmem:[%s750_s1 + $0x1b8] sm:$0xff]  ;;  %v79_v59 = vld [vmem:[%s750_s1 + $0x1c8] sm:$0xff] }
  0x1c   :  { %400 = vmatpush3.bf16.msra.mxu1 %v399_v23  ;;  %v373_v56 = vpack.c.bf16 %v77_v54, %v75_v53  ;;  %v76_v58 = vld [vmem:[%s750_s1 + $0x1b0] sm:$0xff]  ;;  %v81_v60 = vld [vmem:[%s750_s1 + $0x1d8] sm:$0xff]  ;;  %v78_v63 = vld [vmem:[%s750_s1 + $0x1c0] sm:$0xff] }
  0x1d   :  { %348 = vmatpush1.bf16.msra.mxu0 %v347_v51  ;;  %402 = vmatprep.subr.bf16.mxu1 %v401_v24  ;;  %v70_v51 = vld [vmem:[%s750_s1 + $0x180] sm:$0xff]  ;;  %v377_v62 = vpack.c.bf16 %v81_v60, %v79_v59  ;;  %v80_v0 = vld [vmem:[%s750_s1 + $0x1d0] sm:$0xff]  ;;  %v83_v1 = vld [vmem:[%s750_s1 + $0x1e8] sm:$0xff] }
  0x1e   :  { %350 = vmatprep.subr.bf16.mxu0 %v349_v57  ;;  %v371_v55 = vpack.c.bf16 %v72_v52, %v70_v51  ;;  %v74_v57 = vld [vmem:[%s750_s1 + $0x1a0] sm:$0xff]  ;;  %v85_v2 = vld [vmem:[%s750_s1 + $0x1f8] sm:$0xff]  ;;  %v184_v10 = vld [vmem:[%s752_s3 + $0x68] sm:$0xff] }
  0x1f   :  { %v375_v61 = vpack.c.bf16 %v76_v58, %v74_v57  ;;  %v381_v4 = vpack.c.bf16 %v85_v2, %v83_v1  ;;  %v82_v5 = vld [vmem:[%s750_s1 + $0x1e0] sm:$0xff]  ;;  %v201_v12 = vld [vmem:[%s752_s3 + $0xf0] sm:$0xff]  ;;  %v202_v13 = vld [vmem:[%s752_s3 + $0xf8] sm:$0xff] }
  0x20   :  { %404 = vmatpush3.bf16.msra.mxu1 %v403_v35  ;;  %v20_v8 = vld [vmem:[%s751_s0] sm:$0xff]  ;;  %v413_v14 = vpack.c.bf16 %v202_v13, %v201_v12  ;;  %v186_v16 = vld [vmem:[%s752_s3 + $0x78] sm:$0xff] }
  0x21   :  { %352 = vmatpush1.bf16.msra.mxu0 %v351_v3  ;;  %406 = vmatprep.subr.bf16.mxu1 %v405_v36  ;;  %v379_v3 = vpack.c.bf16 %v80_v0, %v78_v63  ;;  %v183_v9 = vld [vmem:[%s752_s3 + $0x60] sm:$0xff] }
  0x22   :  { %354 = vmatprep.subr.bf16.mxu0 %v353_v6  ;;  %v84_v6 = vld [vmem:[%s750_s1 + $0x1f0] sm:$0xff]  ;;  %v411_v11 = vpack.c.bf16 %v184_v10, %v183_v9  ;;  %v86_v21 = vld [vmem:[%s753_s2] sm:$0x3] }
  0x23   :  { %v383_v7 = vpack.c.bf16 %v84_v6, %v82_v5  ;;  %v285_v32 = vld [vmem:[%s754_s4] ss:$0 sm:$0xff] }
  0x24   :  { %408 = vmatpush3.bf16.msra.mxu1 %v407_v47 }
  0x25   :  { %356 = vmatpush1.bf16.msra.mxu0 %v355_v15  ;;  %410 = vmatprep.subr.bf16.mxu1 %v409_v48  ;;  %v185_v15 = vld [vmem:[%s752_s3 + $0x70] sm:$0xff] }
  0x26   :  { %358 = vmatprep.subr.bf16.mxu0 %v357_v18  ;;  %v415_v17 = vpack.c.bf16 %v186_v16, %v185_v15  ;;  %v88_v18 = vlaneseq }
  0x28   :  { %412 = vmatpush3.bf16.msra.mxu1 %v411_v11  ;;  %v89_v19 = vshrl.u32 %v88_v18, 7 }
  0x29   :  { %360 = vmatpush1.bf16.msra.mxu0 %v359_v27  ;;  %414 = vmatprep.subr.bf16.mxu1 %v413_v14 }
  0x2a   :  { %362 = vmatprep.subr.bf16.mxu0 %v361_v30  ;;  %v90_v20 = vsub.s32 0, %v89_v19  ;;  %v94_v22 = vsub.s32 1, %v89_v19 }
  0x2c   :  { %416 = vmatpush3.bf16.msra.mxu1 %v415_v17  ;;  %v91_v23 = vrot.slane %v86_v21, %v90_v20  ;;  %v95_v24 = vrot.slane %v86_v21, %v94_v22 }
  0x2d   :  { %364 = vmatpush1.bf16.msra.mxu0 %v363_v39 }
  0x2e   :  { %366 = vmatprep.subr.bf16.mxu0 %v365_v42 }
  0x31   :  { %368 = vmatpush1.bf16.msra.mxu0 %v367_v49 }
  0x32   :  { %370 = vmatprep.subr.bf16.mxu0 %v369_v50 }
  0x35   :  { %372 = vmatpush1.bf16.msra.mxu0 %v371_v55 }
  0x36   :  { %374 = vmatprep.subr.bf16.mxu0 %v373_v56 }
  0x39   :  { %376 = vmatpush1.bf16.msra.mxu0 %v375_v61 }
  0x3a   :  { %378 = vmatprep.subr.bf16.mxu0 %v377_v62 }
  0x3d   :  { %380 = vmatpush1.bf16.msra.mxu0 %v379_v3 }
  0x3e   :  { %382 = vmatprep.subr.bf16.mxu0 %v381_v4 }
  0x41   :  { %384 = vmatpush1.bf16.msra.mxu0 %v383_v7 }
  0x44   :  { %163 = vmatmul.mubr.f32.vlgmr.msra.gmra.mrb[0].mxu0 %v20_v8 }
 0x117   :  { %v164_v25 = vpop.f32.mrb[0].mxu0 }
 0x118   :  { %v165_v26 = vadd.f32 %v164_v25, %v91_v23  ;;  %v166_v27 = vpop.f32.mrb[1].mxu0 }
 0x119   :  { %v167_v28 = vadd.f32 %v166_v27, %v95_v24 }
 0x11a   :  { %v169_v30 = vmax.f32 %v165_v26, 0.0 }
 0x11b   :  { %v170_v29 = vmax.f32 %v167_v28, 0.0 }
 0x11d   :  { %274 = vmatprep.mubr.f32.mxu1 %v170_v29 }
 0x11e   :  { %275 = vmatmul.mubr.f32.vlgmr.msra.gmra.mrb[0].mxu1 %v169_v30 }
 0x1f1   :  { %v318_v31 = vpop.f32.mrb[0].mxu1 }
 0x1f2   :  { %v319_v33 = vpop.f32.mrb[1].mxu1 }
 0x1f3   :  { %v320_v34 = vadd.f32 %v319_v33, %v318_v31 }
 0x1f5   :  { %v277_v35 = vadd.f32 %v320_v34, %v285_v32 }
 0x1f7   :  { %280 = vst [vmem:[%s755_s5] sm:$0xff] %v277_v35 }

</bundles_post_ra>
